<compile_context>
chip_gen: v6e
topology: v6e:2x2x1
jax: 0.10.0
libtpu: 0.0.40
codegen_flags: <defaults>
</compile_context>

<pallas_src>
import functools
import math

import jax
import jax.numpy as jnp
from jax.experimental import pallas as pl
from jax.experimental.pallas import tpu as pltpu

_LANE = 1024                       # preferred lane-dense slab width (multiple of 128)
_TWO_PI = 6.283185307179586


def _act_kernel(x_ref, o_ref, *, act_name: str, compute_dtype):
    """Elementwise activation on one (block_rows, cols) VMEM tile."""
    x = x_ref[...].astype(compute_dtype)
    if act_name == "tanh":
        out = jnp.tanh(x)
    elif act_name == "srelu":
        out = jnp.maximum(x, 0.0) * jnp.maximum(1.0 - x, 0.0)
    elif act_name == "s2relu":
        out = (jnp.maximum(x, 0.0)
               * jnp.maximum(1.0 - x, 0.0)
               * jnp.sin(_TWO_PI * x))
    else:  # unreachable: wrapper short-circuits identity
        out = x
    o_ref[...] = out.astype(o_ref.dtype)


def _device_kind() -> str:
    try:
        return jax.devices()[0].device_kind.lower()
    except Exception:
        return ""


def _sublane_multiple(itemsize: int) -> int:
    # f32 -> 8, bf16/fp16 -> 16, int8/fp8 -> 32 (sublane packing).
    return max(8, 32 // max(1, itemsize))


def _tile_policy():
    kind = _device_kind()
    is_v5_or_older = any(t in kind for t in ("v2", "v3", "v4", "v5"))
    is_v7 = "7" in kind
    # Per-tile byte budget: 2 MiB on v5e-and-older (16 MiB scoped VMEM default),
    # 4 MiB on v6e/v7x (32 MiB default). 2-in + 2-out double buffers -> 8 / 16 MiB.
    tile_bytes = (2 << 20) if is_v5_or_older else (4 << 20)
    return tile_bytes, is_v7, is_v5_or_older


def _choose_block_rows(rows: int, cols: int, itemsize: int,
                       tile_bytes: int, prefer_two_steps: bool) -> int:
    sub = _sublane_multiple(itemsize)
    max_rows = max(sub, (tile_bytes // (cols * itemsize)) // sub * sub)
    if prefer_two_steps and rows > 2 * sub:
        # Cap so the parallel grid axis has >= 2 steps (keeps both v7x TCs busy).
        half = ((pl.cdiv(rows, 2) + sub - 1) // sub) * sub
        max_rows = min(max_rows, max(sub, half))
    if rows <= max_rows:
        return rows            # single full-extent block: always a legal block shape
    return max_rows            # multiple of the sublane packing -> (8,128)-legal


def my_act_func(x: jax.Array, act_name: str = "linear") -> jax.Array:
    """Pallas implementation of my_actFunc.forward for arbitrary-shaped inputs."""
    act = str(act_name).lower()
    if act not in ("tanh", "srelu", "s2relu"):
        # Identity: no kernel launch, no HBM round trip.
        return x

    assert jnp.issubdtype(x.dtype, jnp.floating), "activation expects a floating dtype"

    orig_shape = x.shape
    n_elem = int(math.prod(orig_shape)) if orig_shape else 1
    if n_elem == 0:
        return x               # empty-input guard (grid=(0,) would be rejected)

    dtype = x.dtype
    itemsize = jnp.dtype(dtype).itemsize

    # Fast path: widest lane-dense column width dividing n_elem -> zero-copy reshape,
    # no pad, no trailing slice, fully unmasked stores.
    cols = 0
    for c in (_LANE, 512, 256, 128):
        if n_elem % c == 0:
            cols = c
            break
    if cols:
        rows = n_elem // cols
        x2d = x.reshape(rows, cols)
        padded_elems = n_elem
    else:
        # Truly ragged element count: pad only to the next multiple of _LANE.
        # Zero padding is safe: tanh/srelu/s2relu all map 0 -> 0 and the tail is sliced off.
        cols = _LANE
        padded_elems = pl.cdiv(n_elem, _LANE) * _LANE
        rows = padded_elems // _LANE
        flat = jnp.pad(x.reshape(-1), (0, padded_elems - n_elem))
        x2d = flat.reshape(rows, cols)

    tile_bytes, prefer_two_steps, is_old_chip = _tile_policy()
    block_rows = _choose_block_rows(rows, cols, itemsize, tile_bytes, prefer_two_steps)
    grid = (pl.cdiv(rows, block_rows),)   # Pallas masks the partial last row-block

    # Compute dtype: native bf16/fp16 on v6e/v7x (bf16 VPU/EUP); upcast to f32 only
    # on v5-and-older chips (no bf16 VPU/EUP).  f32 inputs stay f32 (no-op cast).
    compute_dtype = jnp.float32 if (is_old_chip or itemsize >= 4) else dtype

    cost = pl.CostEstimate(
        flops=4 * padded_elems,
        transcendentals=padded_elems if act in ("tanh", "s2relu") else 0,
        bytes_accessed=2 * padded_elems * itemsize,
    )

    kernel = functools.partial(_act_kernel, act_name=act, compute_dtype=compute_dtype)
    out2d = pl.pallas_call(
        kernel,
        out_shape=jax.ShapeDtypeStruct((rows, cols), dtype),
        grid_spec=pltpu.PrefetchScalarGridSpec(
            num_scalar_prefetch=0,
            grid=grid,
            in_specs=[pl.BlockSpec((block_rows, cols), lambda i: (i, 0))],
            out_specs=pl.BlockSpec((block_rows, cols), lambda i: (i, 0)),
        ),
        compiler_params=pltpu.CompilerParams(
            dimension_semantics=("parallel",),
        ),
        cost_estimate=cost,
    )(x2d)

    if padded_elems == n_elem:
        return out2d.reshape(orig_shape)
    return out2d.reshape(-1)[:n_elem].reshape(orig_shape)


def _reference(x, act_name):
    act = str(act_name).lower()
    if act == "tanh":
        return jnp.tanh(x)
    if act == "srelu":
        return jnp.maximum(x, 0.0) * jnp.maximum(1.0 - x, 0.0)
    if act == "s2relu":
        return (jnp.maximum(x, 0.0) * jnp.maximum(1.0 - x, 0.0)
                * jnp.sin(2.0 * jnp.pi * x))
    return x


if __name__ == "__main__":
    ok = True
    k0, k1, k2, k3 = jax.random.split(jax.random.PRNGKey(0), 4)

    # Lane-aligned fast path (no pad): (16, 256) -> viewed as (4, 1024).
    x_a = jax.random.normal(k0, (16, 256), dtype=jnp.float32)
    # 4-D shape: (2, 4, 16, 16) -> 2048 elems -> (2, 1024) fast path.
    x_b = jax.random.normal(k1, (2, 4, 16, 16), dtype=jnp.float32)
    # Ragged shape exercising the pad + trailing-slice fallback.
    x_c = jax.random.normal(k2, (7, 130), dtype=jnp.float32)
    # bf16 input: computed natively in bf16 on v6e/v7x, f32 on v5e.
    x_d = jax.random.normal(k3, (32, 512), dtype=jnp.bfloat16)

    cases = (
        [(x_a, a, 1e-5) for a in ("tanh", "srelu", "s2relu", "linear")]
        + [(x_b, a, 1e-5) for a in ("tanh", "srelu", "s2relu")]
        + [(x_c, a, 1e-5) for a in ("tanh", "srelu", "s2relu")]
        + [(x_d, a, 2e-2) for a in ("tanh", "srelu", "s2relu")]
    )
    for x, act, tol in cases:
        out = jax.block_until_ready(my_act_func(x, act_name=act))
        ref = _reference(x, act)
        good = (
            out.shape == x.shape
            and out.dtype == x.dtype
            and jnp.allclose(out.astype(jnp.float32), ref.astype(jnp.float32),
                             atol=tol, rtol=tol)
        )
        if not good:
            ok = False
            print(f"MISMATCH act={act} shape={x.shape} dtype={x.dtype}")

    if ok:
        print("KERNEL_OK")
</pallas_src>

<mosaic_0001>
module attributes {stable_mosaic.version = 11 : i64} {
  func.func @_act_kernel(%arg0: i32, %arg1: memref<4x1024xf32, #tpu.memory_space<vmem>>, %arg2: memref<4x1024xf32, #tpu.memory_space<vmem>>) attributes {dimension_semantics = [#tpu.dimension_semantics<parallel>], iteration_bounds = array<i64: 1>, scalar_prefetch = 0 : i64, scratch_operands = 0 : i64, tpu.core_type = #tpu.core_type<tc>, window_params = [{transform_indices = @transform_0, window_bounds = array<i64: 4, 1024>}, {transform_indices = @transform_1, window_bounds = array<i64: 4, 1024>}]} {
    %c0 = arith.constant 0 : index
    %c0_0 = arith.constant 0 : index
    %0 = vector.load %arg1[%c0, %c0_0] : memref<4x1024xf32, #tpu.memory_space<vmem>>, vector<4x1024xf32>
    %1 = math.tanh %0 : vector<4x1024xf32>
    %c0_1 = arith.constant 0 : index
    %c0_2 = arith.constant 0 : index
    %2 = vector.load %arg2[%c0_1, %c0_2] : memref<4x1024xf32, #tpu.memory_space<vmem>>, vector<4x1024xf32>
    tpu.vector_store %arg2[%c0_1, %c0_2], %1 {strides = array<i32>} : memref<4x1024xf32, #tpu.memory_space<vmem>>, vector<4x1024xf32>,
    return
  }
  func.func @transform_0(%arg0: i32) -> (i32, i32) {
    %c0_i32 = arith.constant 0 : i32
    %c0_i32_0 = arith.constant 0 : i32
    return %arg0, %c0_i32 : i32, i32
  }
  func.func @transform_1(%arg0: i32) -> (i32, i32) {
    %c0_i32 = arith.constant 0 : i32
    %c0_i32_0 = arith.constant 0 : i32
    return %arg0, %c0_i32 : i32, i32
  }
}

</mosaic_0001>

<bundles_post_ra>
// kernel: tpu_custom_call.1
= control target key start
LH: loop header
LB: loop body
LE: loop exit
PB: predicated region body
PF: predicated region fallthrough
CT: control target
= control target key end

     0   :  { %6 = vsyncpa [#allocation3], 0  ;;  %s120_s0 = inlined_call_operand.hbm [shape: f32[4,1024], index: 0, kind: input, shape index: {}]   ;;  %s121_s1 = inlined_call_operand.hbm [shape: f32[4,1024], index: 1, kind: output, shape index: {}]  }
   0x1   :  { %7 = vsyncpa [#allocation4], 0  ;;  %s102_s6 = smov [#allocation2]  }
   0x2   :  { %s14_s7 = sshll.u32 %s102_s6, 4  ;;  %s15_s7 = int_to_ptr.vmem [resolvable:$true] %s14_s7 }
   0x3   :  { %s66_s8 = scalar_lea.vmem %s15_s7, 512  ;;  %p71_p1 = scmp.lt.s32.totalorder %s15_s7, %s15_s7 }
   0x4   :  { %p67_p0 = scmp.ne.s32.totalorder %s15_s7, %s66_s8  ;;  %p72_p2 = scmp.lt.s32.totalorder %s66_s8, %s66_s8 }
   0x6   :  { %p73_p3 = por %p72_p2, %p71_p1 }
   0x8   :  { %p74_p4 = pnand %p73_p3, %p67_p0 }
   0xa   :  { %77 = shalt.err (!%p74_p4)
}
   0xb   :  { %17 = dma.hbm_to_vmem [thread:$0]  %s120_s0, 512, %s15_s7, [#allocation3]  }
   0xc   :  { %98 = dma.done.wait [#allocation3], 512  }
   0xd   :  { %99 = vsyncadd [#allocation3], 4294966784  ;;  %v21_v0 = vld [vmem:[#allocation2] sm:$0xff]  ;;  %v22_v1 = vld [vmem:[#allocation2 + $0x8] sm:$0xff]  ;;  %s103_s11 = smov [#allocation5]  }
   0xe   :  { %v23_v2 = vld [vmem:[#allocation2 + $0x10] sm:$0xff]  ;;  %50 = vtanh.f32 %v21_v0  ;;  %v24_v3 = vld [vmem:[#allocation2 + $0x18] sm:$0xff]  ;;  %s39_s12 = sshll.u32 %s103_s11, 4  ;;  %s40_s12 = int_to_ptr.vmem [resolvable:$true] %s39_s12 }
   0xf   :  { %52 = vtanh.f32 %v22_v1  ;;  %s78_s0 = scalar_lea.vmem %s40_s12, 512  ;;  %p83_p6 = scmp.lt.s32.totalorder %s40_s12, %s40_s12 }
  0x10   :  { %54 = vtanh.f32 %v23_v2  ;;  %p79_p5 = scmp.ne.s32.totalorder %s40_s12, %s78_s0  ;;  %p84_p7 = scmp.lt.s32.totalorder %s78_s0, %s78_s0 }
  0x11   :  { %56 = vtanh.f32 %v24_v3 }
  0x12   :  { %p85_p8 = por %p84_p7, %p83_p6 }
  0x14   :  { %p86_p9 = pnand %p85_p8, %p79_p5 }
  0x1b   :  { %v51_v4 = vpop.eup %50 }
  0x1c   :  { %v53_v5 = vpop.eup %52  ;;  %29 = vst [vmem:[#allocation5] sm:$0xff] %v51_v4 }
  0x1d   :  { %v55_v6 = vpop.eup %54  ;;  %30 = vst [vmem:[#allocation5 + $0x8] sm:$0xff] %v53_v5 }
  0x1e   :  { %v57_v7 = vpop.eup %56  ;;  %31 = vst [vmem:[#allocation5 + $0x10] sm:$0xff] %v55_v6 }
  0x1f   :  { %32 = vst [vmem:[#allocation5 + $0x18] sm:$0xff] %v57_v7 }
  0x20   :  { %89 = shalt.err (!%p86_p9)
}
  0x21   :  { %42 = dma.vmem_to_hbm [thread:$0]  %s40_s12, 512, %s121_s1, [#allocation4]  }
  0x22   :  { %100 = dma.done.wait [#allocation4], 512  }
  0x23   :  { %101 = vsyncadd [#allocation4], 4294966784 }
  0x24   :  { %46 = vsyncpa [#allocation3], 1 }
  0x25   :  { %47 = vsyncpa [#allocation4], 1 }

</bundles_post_ra>
